<compile_context>
chip_gen: v6e
topology: v6e:2x2x1
jax: 0.10.0
libtpu: 0.0.40
codegen_flags: <defaults>
</compile_context>

<pallas_src>
import jax
import jax.numpy as jnp
from jax.experimental import pallas as pl
from jax.experimental.pallas import tpu as pltpu


def _gap_encoder_kernel(emb_ref, mask_ref, bb_ref, bi_ref, wb_hbm, wi_hbm,
                        out_ref, wb_vmem, wi_vmem, sem):
    # emb_ref : (Bt, L_s, H)  compute dtype     mask_ref: (Bt, L_s, 1) f32
    # bb_ref  : (1, G) f32                       bi_ref : (1, G) f32
    # wb_hbm / wi_hbm : (H, G) HBM refs (memory_space=ANY), copied once into
    #   wb_vmem / wi_vmem VMEM scratch (single-buffered, persists across steps).
    # out_ref : (Bt, L_s + 1, G) f32
    bt, l_s, h = emb_ref.shape
    g = out_ref.shape[-1]

    # Single-buffer the grid-invariant weights: one DMA each, issued on step 0
    # and overlapped with the weight-independent pooling below.
    @pl.when(pl.program_id(0) == 0)
    def _():
        pltpu.make_async_copy(wb_hbm, wb_vmem, sem.at[0]).start()
        pltpu.make_async_copy(wi_hbm, wi_vmem, sem.at[1]).start()

    emb = emb_ref[...]                                        # (Bt, L_s, H)

    # Masked-mean pooling on the VPU (f32) + sublane reduce (XLU); the scaled
    # mask already contains 1/denominator, so no divide and no MXU involvement.
    ctx = jnp.sum(emb.astype(jnp.float32) * mask_ref[...], axis=1)   # (Bt, H)

    @pl.when(pl.program_id(0) == 0)
    def _():
        pltpu.make_async_copy(wb_hbm, wb_vmem, sem.at[0]).wait()
        pltpu.make_async_copy(wi_hbm, wi_vmem, sem.at[1]).wait()

    # BOS projection: (Bt, H) @ (H, G), f32 accumulation.
    bos = jnp.dot(ctx.astype(emb.dtype), wb_vmem[...],
                  preferred_element_type=jnp.float32) + bb_ref[...]
    out_ref[:, 0:1, :] = bos.reshape(bt, 1, g).astype(out_ref.dtype)

    # Internal projection: one (Bt*L_s, H) @ (H, G) matmul (fills the MXU M dim).
    internal = jnp.dot(emb.reshape(bt * l_s, h), wi_vmem[...],
                       preferred_element_type=jnp.float32) + bi_ref[...]
    out_ref[:, 1:, :] = internal.reshape(bt, l_s, g).astype(out_ref.dtype)


def _round_up(x, m):
    return ((x + m - 1) // m) * m


def _vmem_tile_bytes(rows, cols, dtype):
    """Padded VMEM footprint of the (rows, cols) slab of a block."""
    item = jnp.dtype(dtype).itemsize
    sub = 8 * max(1, 4 // item)                     # sublane packing (bf16 -> 16)
    return _round_up(max(rows, 1), sub) * _round_up(max(cols, 1), 128) * item


def gap_encoder_forward(s_hard_embeds, s_hard_attention_mask, params):
    """
    s_hard_embeds:         (B, L_s, H)  (f32 or bf16; consumed in native dtype)
    s_hard_attention_mask: (B, L_s) or None
    params: 'wb' (H, H_gap), 'bb' (H_gap,), 'wi' (H, H_gap), 'bi' (H_gap,)
            (weights stored as (in, out) = torch Linear.weight.T)
    Returns h_gap: (B, L_s + 1, H_gap) in f32 (the accumulator precision).
    """
    B, L_s, H = s_hard_embeds.shape
    H_gap = params["wb"].shape[1]
    cdtype = s_hard_embeds.dtype                    # compute / operand dtype

    if L_s == 0:
        # TODO(synk): degenerate L_s == 0 branch stays in plain JAX (no hot path).
        ctx = jnp.zeros((B, H), dtype=jnp.float32)
        bos = ctx @ params["wb"].astype(jnp.float32) + params["bb"].astype(jnp.float32)
        return bos[:, None, :]

    # ---- fold the masked-mean denominator into the mask (no divide in kernel) ----
    if s_hard_attention_mask is None:
        mask_scaled = jnp.full((B, L_s), 1.0 / L_s, dtype=jnp.float32)
    else:
        m = s_hard_attention_mask.astype(jnp.float32).reshape(B, L_s)
        denom = jnp.maximum(jnp.sum(m, axis=1, keepdims=True), 1.0)
        mask_scaled = m / denom
    mask3 = mask_scaled.reshape(B, L_s, 1)

    # ---- weights / biases (casts guarded: no-op when already in compute dtype) ----
    wb = params["wb"] if params["wb"].dtype == cdtype else params["wb"].astype(cdtype)
    wi = params["wi"] if params["wi"].dtype == cdtype else params["wi"].astype(cdtype)
    bb = params["bb"].astype(jnp.float32).reshape(1, H_gap)
    bi = params["bi"].astype(jnp.float32).reshape(1, H_gap)

    # ---- generation-aware VMEM budget & batch tile ----
    try:
        vmem_cap = pltpu.get_tpu_info().vmem_capacity_bytes
    except Exception:
        vmem_cap = 64 << 20                         # conservative (v7x per-TC)
    per_row = (_vmem_tile_bytes(L_s, H, cdtype)             # embeddings
               + _vmem_tile_bytes(L_s, 1, jnp.float32)      # scaled mask
               + _vmem_tile_bytes(L_s + 1, H_gap, jnp.float32))  # output
    weights_vmem = (2 * _vmem_tile_bytes(H, H_gap, cdtype)          # single-buffered
                    + 4 * _vmem_tile_bytes(1, H_gap, jnp.float32))  # biases (2x buf)
    budget = int(vmem_cap * 0.7)

    Bt = max(1, min(B, 2048 // (L_s + 1)))          # target ~2k rows per grid step
    while Bt > 1 and weights_vmem + 2 * Bt * per_row > budget:
        Bt //= 2
    # TODO(synk): if even Bt == 1 exceeds the budget (very long L_s / huge H), an
    # L_s grid axis plus K-tiling of the weights would be needed.

    # Prefer a divisor of B (avoids a wrapper-side pad pass over the embeddings).
    d = Bt
    while B % d != 0:
        d -= 1
    if d >= max(1, Bt // 4):
        Bt, B_pad = d, B
    else:
        B_pad = _round_up(B, Bt)

    emb_p, mask_p = s_hard_embeds, mask3
    if B_pad != B:                                  # guarded: usually a no-op
        emb_p = jnp.pad(emb_p, ((0, B_pad - B), (0, 0), (0, 0)))
        mask_p = jnp.pad(mask_p, ((0, B_pad - B), (0, 0), (0, 0)))

    grid = (B_pad // Bt,)
    esz = jnp.dtype(cdtype).itemsize
    flops = (2 * B_pad * L_s * H * H_gap            # internal projection
             + 2 * B_pad * H * H_gap                # bos projection
             + 2 * B_pad * L_s * H)                 # pooling
    bytes_accessed = (B_pad * L_s * H * esz + B_pad * L_s * 4
                      + 2 * H * H_gap * esz + 2 * H_gap * 4
                      + B_pad * (L_s + 1) * H_gap * 4)
    vmem_est = weights_vmem + 2 * Bt * per_row
    vmem_limit = min(max(int(vmem_est * 1.5) + (4 << 20), 32 << 20),
                     int(vmem_cap * 3 // 4))        # always set; <=75% of physical

    out = pl.pallas_call(
        _gap_encoder_kernel,
        out_shape=jax.ShapeDtypeStruct((B_pad, L_s + 1, H_gap), jnp.float32),
        grid_spec=pltpu.PrefetchScalarGridSpec(
            num_scalar_prefetch=0,
            grid=grid,
            in_specs=[
                pl.BlockSpec((Bt, L_s, H), lambda b: (b, 0, 0)),   # embeddings
                pl.BlockSpec((Bt, L_s, 1), lambda b: (b, 0, 0)),   # scaled mask
                pl.BlockSpec((1, H_gap), lambda b: (0, 0)),        # b_bos
                pl.BlockSpec((1, H_gap), lambda b: (0, 0)),        # b_int
                pl.BlockSpec(memory_space=pl.ANY),                 # W_bos (HBM)
                pl.BlockSpec(memory_space=pl.ANY),                 # W_int (HBM)
            ],
            out_specs=pl.BlockSpec((Bt, L_s + 1, H_gap), lambda b: (b, 0, 0)),
            scratch_shapes=[
                pltpu.VMEM((H, H_gap), cdtype),     # W_bos, single-buffered
                pltpu.VMEM((H, H_gap), cdtype),     # W_int, single-buffered
                pltpu.SemaphoreType.DMA((2,)),
            ],
        ),
        compiler_params=pltpu.CompilerParams(
            dimension_semantics=("parallel",),
            vmem_limit_bytes=vmem_limit),
        cost_estimate=pl.CostEstimate(
            flops=flops, transcendentals=0, bytes_accessed=bytes_accessed),
    )(emb_p, mask_p, bb, bi, wb, wi)

    if B_pad != B:
        out = out[:B]
    return out


def _reference_forward(emb, mask, params):
    # pure-JAX f32 reference mirroring the PyTorch module
    if mask is None:
        ctx = emb.mean(axis=1)
    else:
        m = mask.astype(jnp.float32)[..., None]
        ctx = (emb * m).sum(axis=1) / jnp.maximum(m.sum(axis=1), 1.0)
    bos = ctx @ params["wb"] + params["bb"]
    internal = emb @ params["wi"] + params["bi"]
    return jnp.concatenate([bos[:, None, :], internal], axis=1)


if __name__ == "__main__":
    # small shapes consistent with the module's forward
    B, L_s, H, H_gap = 2, 8, 32, 32

    key = jax.random.PRNGKey(0)
    k_emb, k_mask, k_wb, k_bb, k_wi, k_bi = jax.random.split(key, 6)

    # Activations arrive in bf16 (model dtype) -> halved HBM traffic, native MXU rate.
    s_hard_embeds = jax.random.normal(
        k_emb, (B, L_s, H), dtype=jnp.float32).astype(jnp.bfloat16)
    # deterministic 0/1 attention mask (keep at least one valid token per row)
    mask = (jax.random.uniform(k_mask, (B, L_s)) > 0.3).astype(jnp.float32)
    mask = mask.at[:, 0].set(1.0)

    params = {
        "wb": jax.random.normal(k_wb, (H, H_gap), dtype=jnp.float32) * 0.02,
        "bb": jax.random.normal(k_bb, (H_gap,), dtype=jnp.float32) * 0.02,
        "wi": jax.random.normal(k_wi, (H, H_gap), dtype=jnp.float32) * 0.02,
        "bi": jax.random.normal(k_bi, (H_gap,), dtype=jnp.float32) * 0.02,
    }

    h_gap = gap_encoder_forward(s_hard_embeds, mask, params)
    h_gap = jax.block_until_ready(h_gap)

    ref = _reference_forward(s_hard_embeds.astype(jnp.float32), mask, params)
    assert h_gap.shape == (B, L_s + 1, H_gap)
    err = float(jnp.max(jnp.abs(h_gap.astype(jnp.float32) - ref)))
    # tolerance covers bf16 operand rounding + default-precision MXU passes
    assert jnp.allclose(h_gap.astype(jnp.float32), ref, atol=1e-2, rtol=2e-2), err

    print("KERNEL_OK")
</pallas_src>

<mosaic_0001>
module attributes {stable_mosaic.version = 11 : i64} {
  func.func @_gap_encoder_kernel(%arg0: i32, %arg1: memref<2x8x32xbf16, #tpu.memory_space<vmem>>, %arg2: memref<2x8x1xf32, #tpu.memory_space<vmem>>, %arg3: memref<1x32xf32, #tpu.memory_space<vmem>>, %arg4: memref<1x32xf32, #tpu.memory_space<vmem>>, %arg5: memref<32x32xbf16, #tpu.memory_space<any>>, %arg6: memref<32x32xbf16, #tpu.memory_space<any>>, %arg7: memref<2x9x32xf32, #tpu.memory_space<vmem>>, %arg8: memref<32x32xbf16, #tpu.memory_space<vmem>>, %arg9: memref<32x32xbf16, #tpu.memory_space<vmem>>, %arg10: memref<2x!tpu.dma_semaphore, #tpu.memory_space<semaphore_mem>>) attributes {dimension_semantics = [#tpu.dimension_semantics<parallel>], iteration_bounds = array<i64: 1>, scalar_prefetch = 0 : i64, scratch_operands = 3 : i64, tpu.core_type = #tpu.core_type<tc>, window_params = [{transform_indices = @transform_0, window_bounds = array<i64: 2, 8, 32>}, {transform_indices = @transform_1, window_bounds = array<i64: 2, 8, 1>}, {pipeline_mode = #tpu.pipeline_mode<synchronous>, transform_indices = @transform_2, window_bounds = array<i64: 1, 32>}, {pipeline_mode = #tpu.pipeline_mode<synchronous>, transform_indices = @transform_3, window_bounds = array<i64: 1, 32>}, {}, {}, {transform_indices = @transform_6, window_bounds = array<i64: 2, 9, 32>}]} {
    %c0_i32 = arith.constant 0 : i32
    %0 = arith.cmpi eq, %arg0, %c0_i32 : i32
    %1 = arith.extui %0 : i1 to i32
    %c0_i32_0 = arith.constant 0 : i32
    %2 = arith.cmpi ne, %1, %c0_i32_0 : i32
    scf.if %2 {
      %c0_i32_23 = arith.constant 0 : i32
      %28 = tpu.memref_slice %arg10[%c0_i32_23] : memref<2x!tpu.dma_semaphore, #tpu.memory_space<semaphore_mem>> -> memref<1x!tpu.dma_semaphore, #tpu.memory_space<semaphore_mem>>
      %29 = tpu.memref_squeeze %28 : memref<1x!tpu.dma_semaphore, #tpu.memory_space<semaphore_mem>> -> memref<!tpu.dma_semaphore, #tpu.memory_space<semaphore_mem>>
      tpu.enqueue_dma source(%arg5 : memref<32x32xbf16, #tpu.memory_space<any>>) target(%arg8 : memref<32x32xbf16, #tpu.memory_space<vmem>>) target_semaphore(%29 : memref<!tpu.dma_semaphore, #tpu.memory_space<semaphore_mem>>)
      %c1_i32 = arith.constant 1 : i32
      %30 = tpu.memref_slice %arg10[%c1_i32] : memref<2x!tpu.dma_semaphore, #tpu.memory_space<semaphore_mem>> -> memref<1x!tpu.dma_semaphore, #tpu.memory_space<semaphore_mem>>
      %31 = tpu.memref_squeeze %30 : memref<1x!tpu.dma_semaphore, #tpu.memory_space<semaphore_mem>> -> memref<!tpu.dma_semaphore, #tpu.memory_space<semaphore_mem>>
      tpu.enqueue_dma source(%arg6 : memref<32x32xbf16, #tpu.memory_space<any>>) target(%arg9 : memref<32x32xbf16, #tpu.memory_space<vmem>>) target_semaphore(%31 : memref<!tpu.dma_semaphore, #tpu.memory_space<semaphore_mem>>)
    } else {
    }
    %c0 = arith.constant 0 : index
    %c0_1 = arith.constant 0 : index
    %c0_2 = arith.constant 0 : index
    %3 = vector.load %arg1[%c0, %c0_1, %c0_2] : memref<2x8x32xbf16, #tpu.memory_space<vmem>>, vector<2x8x32xbf16>
    %4 = arith.extf %3 : vector<2x8x32xbf16> to vector<2x8x32xf32>
    %c0_3 = arith.constant 0 : index
    %c0_4 = arith.constant 0 : index
    %c0_5 = arith.constant 0 : index
    %5 = vector.load %arg2[%c0_3, %c0_4, %c0_5] : memref<2x8x1xf32, #tpu.memory_space<vmem>>, vector<2x8x1xf32>
    %6 = vector.broadcast %5 : vector<2x8x1xf32> to vector<2x8x32xf32>
    %7 = arith.mulf %4, %6 : vector<2x8x32xf32>
    %cst = arith.constant dense<0.000000e+00> : vector<2x32xf32>
    %8 = vector.multi_reduction <add>, %7, %cst [1] : vector<2x8x32xf32> to vector<2x32xf32>
    %c0_i32_6 = arith.constant 0 : i32
    %9 = arith.cmpi eq, %arg0, %c0_i32_6 : i32
    %10 = arith.extui %9 : i1 to i32
    %c0_i32_7 = arith.constant 0 : i32
    %11 = arith.cmpi ne, %10, %c0_i32_7 : i32
    scf.if %11 {
      %c0_i32_23 = arith.constant 0 : i32
      %28 = tpu.memref_slice %arg10[%c0_i32_23] : memref<2x!tpu.dma_semaphore, #tpu.memory_space<semaphore_mem>> -> memref<1x!tpu.dma_semaphore, #tpu.memory_space<semaphore_mem>>
      %29 = tpu.memref_squeeze %28 : memref<1x!tpu.dma_semaphore, #tpu.memory_space<semaphore_mem>> -> memref<!tpu.dma_semaphore, #tpu.memory_space<semaphore_mem>>
      tpu.wait_dma2 semaphore(%29 : memref<!tpu.dma_semaphore, #tpu.memory_space<semaphore_mem>>) src(%arg5 : memref<32x32xbf16, #tpu.memory_space<any>>) dst(%arg8 : memref<32x32xbf16, #tpu.memory_space<vmem>>)
      %c1_i32 = arith.constant 1 : i32
      %30 = tpu.memref_slice %arg10[%c1_i32] : memref<2x!tpu.dma_semaphore, #tpu.memory_space<semaphore_mem>> -> memref<1x!tpu.dma_semaphore, #tpu.memory_space<semaphore_mem>>
      %31 = tpu.memref_squeeze %30 : memref<1x!tpu.dma_semaphore, #tpu.memory_space<semaphore_mem>> -> memref<!tpu.dma_semaphore, #tpu.memory_space<semaphore_mem>>
      tpu.wait_dma2 semaphore(%31 : memref<!tpu.dma_semaphore, #tpu.memory_space<semaphore_mem>>) src(%arg6 : memref<32x32xbf16, #tpu.memory_space<any>>) dst(%arg9 : memref<32x32xbf16, #tpu.memory_space<vmem>>)
    } else {
    }
    %12 = arith.truncf %8 : vector<2x32xf32> to vector<2x32xbf16>
    %c0_8 = arith.constant 0 : index
    %c0_9 = arith.constant 0 : index
    %13 = vector.load %arg8[%c0_8, %c0_9] : memref<32x32xbf16, #tpu.memory_space<vmem>>, vector<32x32xbf16>
    %cst_10 = arith.constant dense<0.000000e+00> : vector<2x32xf32>
    %14 = tpu.matmul %12, %13, %cst_10 {dimension_numbers = #tpu.dot_dimension_numbers<[1], [0], [0], [1], [0, 0, 1, 1], [], []>} : vector<2x32xbf16>, vector<32x32xbf16>, vector<2x32xf32> -> vector<2x32xf32>
    %c0_11 = arith.constant 0 : index
    %c0_12 = arith.constant 0 : index
    %15 = vector.load %arg3[%c0_11, %c0_12] : memref<1x32xf32, #tpu.memory_space<vmem>>, vector<1x32xf32>
    %16 = vector.broadcast %15 : vector<1x32xf32> to vector<2x32xf32>
    %17 = arith.addf %14, %16 : vector<2x32xf32>
    %18 = vector.shape_cast %17 : vector<2x32xf32> to vector<2x1x32xf32>
    %c0_13 = arith.constant 0 : index
    %c0_14 = arith.constant 0 : index
    %c0_15 = arith.constant 0 : index
    %19 = vector.load %arg7[%c0_13, %c0_14, %c0_15] : memref<2x9x32xf32, #tpu.memory_space<vmem>>, vector<2x1x32xf32>
    tpu.vector_store %arg7[%c0_13, %c0_14, %c0_15], %18 {strides = array<i32>} : memref<2x9x32xf32, #tpu.memory_space<vmem>>, vector<2x1x32xf32>,
    %20 = vector.shape_cast %3 : vector<2x8x32xbf16> to vector<16x32xbf16>
    %c0_16 = arith.constant 0 : index
    %c0_17 = arith.constant 0 : index
    %21 = vector.load %arg9[%c0_16, %c0_17] : memref<32x32xbf16, #tpu.memory_space<vmem>>, vector<32x32xbf16>
    %cst_18 = arith.constant dense<0.000000e+00> : vector<16x32xf32>
    %22 = tpu.matmul %20, %21, %cst_18 {dimension_numbers = #tpu.dot_dimension_numbers<[1], [0], [0], [1], [0, 0, 1, 1], [], []>} : vector<16x32xbf16>, vector<32x32xbf16>, vector<16x32xf32> -> vector<16x32xf32>
    %c0_19 = arith.constant 0 : index
    %c0_20 = arith.constant 0 : index
    %23 = vector.load %arg4[%c0_19, %c0_20] : memref<1x32xf32, #tpu.memory_space<vmem>>, vector<1x32xf32>
    %24 = vector.broadcast %23 : vector<1x32xf32> to vector<16x32xf32>
    %25 = arith.addf %22, %24 : vector<16x32xf32>
    %26 = vector.shape_cast %25 : vector<16x32xf32> to vector<2x8x32xf32>
    %c0_21 = arith.constant 0 : index
    %c1 = arith.constant 1 : index
    %c0_22 = arith.constant 0 : index
    %27 = vector.load %arg7[%c0_21, %c1, %c0_22] : memref<2x9x32xf32, #tpu.memory_space<vmem>>, vector<2x8x32xf32>
    tpu.vector_store %arg7[%c0_21, %c1, %c0_22], %26 {strides = array<i32>} : memref<2x9x32xf32, #tpu.memory_space<vmem>>, vector<2x8x32xf32>,
    return
  }
  func.func @transform_0(%arg0: i32) -> (i32, i32, i32) {
    %c0_i32 = arith.constant 0 : i32
    %c0_i32_0 = arith.constant 0 : i32
    %c0_i32_1 = arith.constant 0 : i32
    return %arg0, %c0_i32, %c0_i32_0 : i32, i32, i32
  }
  func.func @transform_1(%arg0: i32) -> (i32, i32, i32) {
    %c0_i32 = arith.constant 0 : i32
    %c0_i32_0 = arith.constant 0 : i32
    %c0_i32_1 = arith.constant 0 : i32
    return %arg0, %c0_i32, %c0_i32_0 : i32, i32, i32
  }
  func.func @transform_2(%arg0: i32) -> (i32, i32) {
    %c0_i32 = arith.constant 0 : i32
    %c0_i32_0 = arith.constant 0 : i32
    %c0_i32_1 = arith.constant 0 : i32
    return %c0_i32, %c0_i32_0 : i32, i32
  }
  func.func @transform_3(%arg0: i32) -> (i32, i32) {
    %c0_i32 = arith.constant 0 : i32
    %c0_i32_0 = arith.constant 0 : i32
    %c0_i32_1 = arith.constant 0 : i32
    return %c0_i32, %c0_i32_0 : i32, i32
  }
  func.func @transform_6(%arg0: i32) -> (i32, i32, i32) {
    %c0_i32 = arith.constant 0 : i32
    %c0_i32_0 = arith.constant 0 : i32
    %c0_i32_1 = arith.constant 0 : i32
    return %arg0, %c0_i32, %c0_i32_0 : i32, i32, i32
  }
}

</mosaic_0001>

<bundles_post_ra>
// kernel: tpu_custom_call.1
= control target key start
LH: loop header
LB: loop body
LE: loop exit
PB: predicated region body
PF: predicated region fallthrough
CT: control target
= control target key end

     0   :  { %11 = vsyncpa [#allocation6], 0  ;;  %s429_s21 = smov [#allocation5]   ;;  %s515_s0 = inlined_call_operand.vmem [shape: bf16[2,8,32], index: 0, kind: input, shape index: {}]   ;;  %s516_s1 = inlined_call_operand.vmem [shape: f32[2,8,1], index: 1, kind: input, shape index: {}]   ;;  %s517_s2 = inlined_call_operand.vmem [shape: f32[1,32], index: 2, kind: input, shape index: {}]   ;;  %s518_s3 = inlined_call_operand.hbm [shape: f32[1,32], index: 3, kind: input, shape index: {}]   ;;  %s519_s4 = inlined_call_operand.vmem [shape: bf16[32,32], index: 4, kind: input, shape index: {}]   ;;  %s520_s5 = inlined_call_operand.hbm [shape: bf16[32,32], index: 5, kind: input, shape index: {}]   ;;  %s521_s6 = inlined_call_operand.vmem [shape: f32[2,9,32], index: 6, kind: output, shape index: {}]  }
   0x1   :  { %s24_s22 = sshll.u32 %s429_s21, 4  ;;  %s25_s22 = int_to_ptr.vmem [resolvable:$true] %s24_s22 }
   0x2   :  { %s391_s23 = scalar_lea.vmem %s25_s22, 16  ;;  %s395_s24 = scalar_lea.vmem %s25_s22, 32 }
   0x3   :  { %p392_p0 = scmp.ne.s32.totalorder %s25_s22, %s391_s23  ;;  %p396_p1 = scmp.lt.s32.totalorder %s25_s22, %s25_s22 }
   0x4   :  { %p397_p2 = scmp.lt.s32.totalorder %s395_s24, %s391_s23 }
   0x6   :  { %p398_p3 = por %p397_p2, %p396_p1 }
   0x8   :  { %p399_p4 = pnand %p398_p3, %p392_p0 }
   0xa   :  { %402 = shalt.err (!%p399_p4)
}
   0xb   :  { %27 = dma.hbm_to_vmem [thread:$0]  %s518_s3, 16, %s25_s22, [#allocation6]  }
   0xc   :  { %423 = dma.done.wait [#allocation6], 16  }
   0xd   :  { %424 = vsyncadd [#allocation6], 4294967280  ;;  %v69_v0 = vld [vmem:[%s519_s4] sm:$0xff]  ;;  %v71_v1 = vld [vmem:[%s519_s4 + $0x8] sm:$0xff]  ;;  %v430_v3 = vmov 0  }
   0xe   :  { %70 = vst [vmem:[#allocation2] sm:$0xff] %v69_v0  ;;  %72 = vst [vmem:[#allocation2 + $0x8] sm:$0xff] %v71_v1  ;;  %v97_v2 = vld [vmem:[%s516_s1] sm:$0xff]  ;;  %378 = vset.pattern.permute.xlu0 %v430_v3 }
   0xf   :  { %80 = vsyncadd [#allocation4], 256  ;;  %101 = vperm.xlu0 %378, %v97_v2   ;;  %v98_v4 = vld [vmem:[%s516_s1 + $0x8] sm:$0xff]  ;;  %s431_s10 = smov [#allocation3]  }
  0x10   :  { %s89_s11 = sshll.u32 %s431_s10, 4  ;;  %s90_s11 = int_to_ptr.vmem [resolvable:$true] %s89_s11 }
  0x11   :  { %s411_s12 = scalar_lea.vmem %s90_s11, 256  ;;  %p416_p6 = scmp.lt.s32.totalorder %s90_s11, %s90_s11 }
  0x12   :  { %p412_p5 = scmp.ne.s32.totalorder %s90_s11, %s411_s12  ;;  %p417_p7 = scmp.lt.s32.totalorder %s411_s12, %s411_s12 }
  0x13   :  { %106 = vperm.xlu0 %378, %v98_v4  }
  0x14   :  { %p418_p8 = por %p417_p7, %p416_p6 }
  0x16   :  { %p419_p9 = pnand %p418_p8, %p412_p5 }
  0x18   :  { %422 = shalt.err (!%p419_p9)  }
  0x19   :  { %92 = dma.hbm_to_vmem [thread:$0]  %s520_s5, 256, %s90_s11, [#allocation4 + $0x1]  ;;  %v93_v5 = vld [vmem:[%s515_s0] sm:$0xf]  ;;  %v94_v7 = vld [vmem:[%s515_s0 + $0x4] sm:$0xf] }
  0x1a   :  { %v95_v6 = vunpack.c.l.bf16 %v93_v5  ;;  %vm111_vm0 = vcmask 261120   ;;  %v96_v10 = vunpack.c.l.bf16 %v94_v7 }
  0x8a   :  { %v102_v8 = vpop.permute.xlu0 %101 }
  0x8b   :  { %v109_v9 = vmul.f32 %v102_v8, %v95_v6 }
  0x8d   :  { %v112_v11 = vsel %vm111_vm0, %v109_v9, 0.0 }
  0x8e   :  { %v113_v12 = vrot.slane %v112_v11, 4  ;;  %v107_v13 = vpop.permute.xlu0 %106 }
  0x8f   :  { %v110_v14 = vmul.f32 %v107_v13, %v96_v10 }
  0x90   :  { %v114_v15 = vadd.f32 %v113_v12, %v112_v11 }
  0x91   :  { %v119_v16 = vsel %vm111_vm0, %v110_v14, 0.0 }
  0x92   :  { %v115_v17 = vrot.slane %v114_v15, 2  ;;  %v120_v18 = vrot.slane %v119_v16, 4 }
  0x94   :  { %v116_v19 = vadd.f32 %v115_v17, %v114_v15  ;;  %v121_v20 = vadd.f32 %v120_v18, %v119_v16 }
  0x96   :  { %v117_v21 = vrot.slane %v116_v19, 1  ;;  %v122_v22 = vrot.slane %v121_v20, 2 }
  0x98   :  { %v118_v23 = vadd.f32 %v117_v21, %v116_v19  ;;  %v123_v24 = vadd.f32 %v122_v22, %v121_v20 }
  0x9a   :  { %v124_v25 = vrot.slane %v123_v24, 1 }
  0x9c   :  { %v125_v26 = vadd.f32 %v124_v25, %v123_v24 }
  0x9d   :  { %425 = dma.done.wait [#allocation4], 256 }
  0x9e   :  { %426 = vsyncadd [#allocation4], 4294967040 }
  0x9f   :  { %427 = dma.done.wait [#allocation4 + $0x1], 256 }
  0xa0   :  { %428 = vsyncadd [#allocation4 + $0x1], 4294967040  ;;  %v432_v27 = vmov 0.0   ;;  %v136_v28 = vpack.c.bf16 %v118_v23, %v118_v23  ;;  %v137_v29 = vpack.c.bf16 %v125_v26, %v125_v26  ;;  %vm433_vm1 = vmmov 0   ;;  %v379_v32 = vld [vmem:[#allocation2 + $0x8] sm:$0xff]   ;;  %v380_v33 = vld [vmem:[#allocation3 + $0x8] sm:$0xff]  }
  0xa1   :  { %356 = vmatprep.subr.bf16.mxu0 %v432_v27  ;;  %364 = vmatprep.subr.bf16.mxu1 %v432_v27  ;;  %vm153_vm2 = vcmask 1041409   ;;  %v381_v34 = vld [vmem:[#allocation2] sm:$0xff]   ;;  %v382_v36 = vld [vmem:[#allocation3] sm:$0xff]   ;;  %v344_v38 = vcombine.low %v93_v5, %v94_v7  ;;  %v434_v39 = vmov 1966171168   ;;  %v215_v41 = vlaneseq }
  0xa2   :  { %360 = vmatprep.mubr.msk.bf16.mxu0 %vm433_vm1, %v432_v27  ;;  %368 = vmatprep.mubr.msk.bf16.mxu1 %vm433_vm1, %v432_v27  ;;  %v151_v30 = vunpack.c.l.b16 %v136_v28  ;;  %v152_v31 = vunpack.c.l.b16 %v137_v29  ;;  %v213_v40 = vunpack.c.l.s4 %v434_v39  ;;  %v339_v44 = vld [vmem:[%s517_s2] ss:$0 sm:$0xff]  ;;  %vm236_vm3 = vcmask 253952  }
  0xa3   :  { %357 = vmatpush3.bf16.msra.mxu0 %v379_v32  ;;  %365 = vmatpush3.bf16.msra.mxu1 %v380_v33  ;;  %v216_v43 = vshrl.u32 %v215_v41, 7  ;;  %v343_v46 = vld [vmem:[#allocation5] ss:$0 sm:$0xff] }
  0xa4   :  { %v154_v35 = vsel %vm153_vm2, %v152_v31, %v151_v30  ;;  %358 = vmatprep.subr.bf16.mxu0 %v432_v27  ;;  %366 = vmatprep.subr.bf16.mxu1 %v432_v27  ;;  %v214_v42 = vunpack.c.0.s8 %v213_v40 }
  0xa5   :  { %v155_v37 = vpack.c.b16 %v154_v35, %v154_v35 }
  0xa6   :  { %v217_v45 = vsub.s32 %v214_v42, %v216_v43 }
  0xa7   :  { %359 = vmatpush3.bf16.msra.mxu0 %v381_v34  ;;  %367 = vmatpush3.bf16.msra.mxu1 %v382_v36 }
  0xaa   :  { %361 = vmatmul.mubr.msk.bf16.vlgmr.msra.gmra.mxu0 %vm111_vm0, %v155_v37  ;;  %369 = vmatmul.mubr.msk.bf16.vlgmr.msra.gmra.mxu1 %vm111_vm0, %v344_v38 }
 0x16a   :  { %v205_v47 = vpop.f32.mrf.mxu0  ;;  %v304_v49 = vpop.f32.mrf.mxu1 }
 0x16b   :  { %v206_v48 = vadd.f32 %v339_v44, %v205_v47  ;;  %v305_v50 = vadd.f32 %v343_v46, %v304_v49 }
 0x16c   :  { %v362_v51 = vpop.f32.mrf.mxu0  ;;  %v370_v53 = vpop.f32.mrf.mxu1 }
 0x16d   :  { %v218_v52 = vrot.slane %v206_v48, %v217_v45  ;;  %311 = vst.msk [vmem:[%s521_s6 + $0x1] sm:$0xff] %vm111_vm0, %v305_v50 }
 0x16e   :  { %v208_v54 = vpop.f32.mrf.mxu0  ;;  %v307_v57 = vpop.f32.mrf.mxu1 }
 0x16f   :  { %v219_v55 = vcombine.high %v218_v52, %v218_v52  ;;  %v226_v56 = vrot.slane %v218_v52, %v217_v45  ;;  %v308_v58 = vadd.f32 %v343_v46, %v307_v57 }
 0x170   :  { %v363_v59 = vpop.f32.mrf.mxu0  ;;  %v371_v61 = vpop.f32.mrf.mxu1 }
 0x171   :  { %v233_v60 = vrot.slane %v219_v55, %v217_v45  ;;  %237 = vst.msk [vmem:[%s521_s6] sm:$0x1] %vm236_vm3, %v226_v56 }
 0x172   :  { %312 = vst.msk [vmem:[%s521_s6 + $0x11] sm:$0xff] %vm111_vm0, %v308_v58 }
 0x173   :  { %238 = vst.msk [vmem:[%s521_s6 + $0x10] sm:$0x1] %vm236_vm3, %v233_v60 }
 0x174   :  { %317 = vsyncpa [#allocation6], 1 }
 0x175   :  { %318 = vsyncmov [#allocation4] }
 0x178   :  { %s319_s24 = vpop.sfrf %318 }
 0x179   :  { %p348_p10 = scmp.ne.s32.totalorder %s319_s24, 0 }
 0x17b   :  { %323 = shalt.err (%p348_p10)  }
 0x17c   :  { %325 = vsyncmov [#allocation4 + $0x1] }
 0x17f   :  { %s326_s25 = vpop.sfrf %325 }
 0x180   :  { %p349_p11 = scmp.ne.s32.totalorder %s326_s25, 0 }
 0x182   :  { %330 = shalt.err (%p349_p11)  }

</bundles_post_ra>
